<compile_context>
chip_gen: v7x
topology: tpu7x:2x2x1
jax: 0.10.0
libtpu: 0.0.40
codegen_flags: <defaults>
</compile_context>

<pallas_src>
import functools

import jax
import jax.numpy as jnp
from jax.experimental import pallas as pl
from jax.experimental.pallas import tpu as pltpu


def make_divisible(v, divisor=8, min_value=None, round_limit=0.9):
    # timm's make_divisible (used by SEModule.__init__)
    min_value = min_value or divisor
    new_v = max(min_value, int(v + divisor / 2) // divisor * divisor)
    if new_v < round_limit * v:
        new_v += divisor
    return new_v


# ---------------------------------------------------------------------------
# Kernel
# ---------------------------------------------------------------------------
def _se_kernel(x_ref, w1_ref, b1_ref, w2_ref, b2_ref, o_ref, *, g, hw, inv_hw):
    """One batch tile of SE on the packed-channel layout.

    x_ref : (Bt, Cp, g*hw)   input tile, native dtype (f32 / bf16)
    w1_ref: (g, Cp, rd) f32  conv_reduce weight (packed channel order)
    b1_ref: (1, rd)     f32
    w2_ref: (g, rd, Cp) f32  conv_expand weight (packed channel order)
    b2_ref: (g, 1, Cp)  f32
    o_ref : (Bt, Cp, g*hw)   output tile (same dtype as x)
    """
    x = x_ref[...]

    # ---- Squeeze (+ conv_reduce fused across the g packed channel slots) ----
    # f32 accumulation; the cast fuses into the reduction, so no f32 copy of
    # the full tile is ever materialized.
    r = b1_ref[...]                                              # (1, rd)
    for k in range(g):
        xk = x[:, :, k * hw:(k + 1) * hw]                        # (Bt, Cp, hw)
        m_k = jnp.sum(xk.astype(jnp.float32), axis=2) * inv_hw   # (Bt, Cp)
        r = r + jnp.dot(m_k, w1_ref[k], preferred_element_type=jnp.float32)
    r = jnp.maximum(r, 0.0)                                      # ReLU (Bt, rd)

    # ---- conv_expand + sigmoid gate, assembled at full lane width ----
    if g == 1:
        e = jnp.dot(r, w2_ref[0], preferred_element_type=jnp.float32) + b2_ref[0]
        gate_full = jax.nn.sigmoid(e).astype(x.dtype)[:, :, None]    # (Bt, Cp, 1)
    else:
        # Per-lane segment id; select-chain builds a lane-dense gate so the
        # final store is a single unmasked full-width store.
        lane_seg = jax.lax.broadcasted_iota(jnp.int32, (1, 1, g * hw), 2) // hw
        gate_full = None
        for k in range(g):
            e = jnp.dot(r, w2_ref[k], preferred_element_type=jnp.float32) + b2_ref[k]
            gk = jax.nn.sigmoid(e).astype(x.dtype)[:, :, None]       # (Bt, Cp, 1)
            gate_full = gk if gate_full is None else jnp.where(lane_seg == k, gk, gate_full)

    # ---- Excite: native-dtype broadcast multiply, one dense store ----
    o_ref[...] = x * gate_full


# ---------------------------------------------------------------------------
# Wrapper helpers
# ---------------------------------------------------------------------------
_MIN_LANES = 128


def _pick_packing(C, HW):
    """Smallest divisor g of C with g*HW >= 128 lanes (1 if HW already wide)."""
    if HW >= _MIN_LANES:
        return 1
    for g in range(1, C + 1):
        if C % g == 0 and g * HW >= _MIN_LANES:
            return g
    return 1   # C*HW < 128: tensor is tiny, packing is pointless


def _tpu_info():
    """(vmem_capacity_bytes, tensorcores_per_chip) with conservative fallbacks."""
    vmem_bytes = 64 * 1024 * 1024          # conservative default (safe on v7x)
    cores_per_chip = 1
    try:
        kind = jax.devices()[0].device_kind.lower()
    except Exception:
        kind = ""
    if "7" in kind:                        # v7x: 2 TensorCores / chip, 64 MiB VMEM
        cores_per_chip = 2
    try:
        vmem_bytes = int(pltpu.get_tpu_info().vmem_capacity_bytes)
    except Exception:
        if kind and "7" not in kind:
            vmem_bytes = 128 * 1024 * 1024  # v4/v5e/v5p/v6e parts
    return vmem_bytes, cores_per_chip


# ---------------------------------------------------------------------------
# Wrapper
# ---------------------------------------------------------------------------
@functools.partial(jax.jit, static_argnames=("block_cap_bytes",))
def se_module_forward(x, w_reduce, b_reduce, w_expand, b_expand,
                      block_cap_bytes=None):
    """x: (B, C, H, W) NCHW, f32 or bf16. Returns same shape/dtype."""
    B, C, H, W = x.shape
    rd = w_reduce.shape[0]
    HW = H * W
    itemsize = jnp.dtype(x.dtype).itemsize

    vmem_bytes, cores_per_chip = _tpu_info()

    # ---- channel packing for lane-dense layout when HW < 128 ----
    g = _pick_packing(C, HW)
    Cp = C // g
    L = g * HW
    x_p = x.reshape(B, Cp, L)            # free: same row-major layout as (B, C, HW)

    # ---- pack / pre-cast the tiny conv weights once in the wrapper ----
    w1t = jnp.transpose(w_reduce).astype(jnp.float32)            # (C, rd)
    w2t = jnp.transpose(w_expand).astype(jnp.float32)            # (rd, C)
    w1p = w1t.reshape(Cp, g, rd).transpose(1, 0, 2)              # (g, Cp, rd)
    w2p = w2t.reshape(rd, Cp, g).transpose(2, 0, 1)              # (g, rd, Cp)
    b1p = b_reduce.reshape(1, rd).astype(jnp.float32)            # (1, rd)
    b2p = b_expand.astype(jnp.float32).reshape(Cp, g).T.reshape(g, 1, Cp)

    # ---- generation-aware batch tiling / VMEM budget ----
    bytes_per_image = C * HW * itemsize
    if block_cap_bytes is None:
        block_cap_bytes = max(1 << 20, vmem_bytes // 10)         # ~6.4MiB v7x / ~12.8MiB v6e
    bt = max(1, min(B, block_cap_bytes // max(1, bytes_per_image)))
    if cores_per_chip > 1 and B > 1:
        # leave >= 2*cores grid steps so each TC gets work and can still
        # overlap DMA with compute.
        bt = min(bt, max(1, pl.cdiv(B, 2 * cores_per_chip)))
    steps = pl.cdiv(B, bt)                                       # padded tail block OK
    block_bytes = bt * bytes_per_image
    # 2x double-buffered (in + out) blocks + in-kernel temps + headroom.
    vmem_need = 6 * block_bytes + (4 << 20)
    vmem_limit = int(min(max(vmem_need, 32 << 20), 0.75 * vmem_bytes))
    # TODO(synk): add a two-phase fallback (spatially tiled squeeze pass, then
    # excite pass) for the rare case where a single image exceeds the one-pass
    # VMEM budget (vmem_need > ~0.75 * physical VMEM).

    kernel = functools.partial(_se_kernel, g=g, hw=HW, inv_hw=1.0 / HW)

    cost = pl.CostEstimate(
        flops=int(2 * B * C * HW + 4 * B * C * rd),
        transcendentals=int(B * C),
        bytes_accessed=int(2 * B * C * HW * itemsize),
    )

    out_p = pl.pallas_call(
        kernel,
        out_shape=jax.ShapeDtypeStruct((B, Cp, L), x.dtype),
        grid_spec=pltpu.PrefetchScalarGridSpec(
            num_scalar_prefetch=0,
            grid=(steps,),
            in_specs=[
                pl.BlockSpec((bt, Cp, L), lambda b: (b, 0, 0)),   # x batch tile
                pl.BlockSpec((g, Cp, rd), lambda b: (0, 0, 0)),   # conv_reduce W
                pl.BlockSpec((1, rd), lambda b: (0, 0)),          # conv_reduce b
                pl.BlockSpec((g, rd, Cp), lambda b: (0, 0, 0)),   # conv_expand W
                pl.BlockSpec((g, 1, Cp), lambda b: (0, 0, 0)),    # conv_expand b
            ],
            out_specs=pl.BlockSpec((bt, Cp, L), lambda b: (b, 0, 0)),
        ),
        compiler_params=pltpu.CompilerParams(
            # On v7x, switch to pltpu.CORE_PARALLEL if a profile shows one idle
            # TensorCore; plain "parallel" is safe on every generation.
            dimension_semantics=("parallel",),
            vmem_limit_bytes=vmem_limit,
        ),
        cost_estimate=cost,
    )(x_p, w1p, b1p, w2p, b2p)

    return out_p.reshape(B, C, H, W)


# ---------------------------------------------------------------------------
# Pure-JAX reference (mirrors the PyTorch forward)
# ---------------------------------------------------------------------------
def se_module_ref(x, w_reduce, b_reduce, w_expand, b_expand):
    xf = x.astype(jnp.float32)
    s = jnp.mean(xf, axis=(2, 3))                                    # (B, C)
    r = jnp.maximum(s @ w_reduce.T.astype(jnp.float32)
                    + b_reduce.astype(jnp.float32), 0.0)
    gate = jax.nn.sigmoid(r @ w_expand.T.astype(jnp.float32)
                          + b_expand.astype(jnp.float32))
    return (xf * gate[:, :, None, None]).astype(x.dtype)


# ---------------------------------------------------------------------------
# Tests
# ---------------------------------------------------------------------------
if __name__ == "__main__":
    key = jax.random.PRNGKey(0)

    def make_params(k, C, rd):
        k1, k2, k3, k4 = jax.random.split(k, 4)
        w_r = jax.random.normal(k1, (rd, C), jnp.float32) * 0.1
        b_r = jax.random.normal(k2, (rd,), jnp.float32) * 0.1
        w_e = jax.random.normal(k3, (C, rd), jnp.float32) * 0.1
        b_e = jax.random.normal(k4, (C,), jnp.float32) * 0.1
        return w_r, b_r, w_e, b_e

    def check(name, x, params, block_cap_bytes=None, atol=1e-5, rtol=1e-5):
        out = se_module_forward(x, *params, block_cap_bytes=block_cap_bytes)
        out = jax.block_until_ready(out)
        ref = se_module_ref(x, *params)
        assert out.shape == x.shape, name
        assert out.dtype == x.dtype, name
        ok = jnp.allclose(out.astype(jnp.float32), ref.astype(jnp.float32),
                          atol=atol, rtol=rtol)
        assert bool(ok), f"mismatch vs reference in case '{name}'"

    # Case 1: HW >= 128 -> lane-dense without packing (g=1), f32.
    B, C, H, W = 5, 64, 16, 16
    rd = make_divisible(C * (1.0 / 16), divisor=8, round_limit=0.0)   # -> 8
    kx, kp, key = jax.random.split(key, 3)
    x = jax.random.normal(kx, (B, C, H, W), jnp.float32)
    params = make_params(kp, C, rd)
    check("f32 hw>=128", x, params)
    # Same inputs with a tiny forced block cap: exercises the cdiv grid with a
    # partial trailing batch block (B=5, Bt=2 -> 3 steps).
    check("f32 forced batch tiling", x, params, block_cap_bytes=128 * 1024)

    # Case 2: HW < 128 (7x7 stage) -> packed-channel lane-dense path (g=4).
    B2, C2, H2, W2 = 3, 32, 7, 7
    rd2 = make_divisible(C2 * (1.0 / 16), divisor=8, round_limit=0.0)  # -> 8
    kx2, kp2, key = jax.random.split(key, 3)
    x2 = jax.random.normal(kx2, (B2, C2, H2, W2), jnp.float32)
    params2 = make_params(kp2, C2, rd2)
    check("f32 hw<128 packed", x2, params2)

    # Case 3: bf16 I/O (f32 accumulation inside the kernel; bf16-ulp tolerance).
    kx3, _ = jax.random.split(key)
    x3 = jax.random.normal(kx3, (4, C, H, W), jnp.float32).astype(jnp.bfloat16)
    check("bf16", x3, params, atol=2e-2, rtol=2e-2)

    print("KERNEL_OK")
</pallas_src>

<mosaic_0001>
module attributes {stable_mosaic.version = 11 : i64} {
  func.func @_se_kernel(%arg0: i32, %arg1: memref<5x64x256xf32, #tpu.memory_space<vmem>>, %arg2: memref<1x64x8xf32, #tpu.memory_space<vmem>>, %arg3: memref<1x8xf32, #tpu.memory_space<vmem>>, %arg4: memref<1x8x64xf32, #tpu.memory_space<vmem>>, %arg5: memref<1x1x64xf32, #tpu.memory_space<vmem>>, %arg6: memref<5x64x256xf32, #tpu.memory_space<vmem>>) attributes {dimension_semantics = [#tpu.dimension_semantics<parallel>], iteration_bounds = array<i64: 1>, scalar_prefetch = 0 : i64, scratch_operands = 0 : i64, tpu.core_type = #tpu.core_type<tc>, window_params = [{transform_indices = @transform_0, window_bounds = array<i64: 5, 64, 256>}, {pipeline_mode = #tpu.pipeline_mode<synchronous>, transform_indices = @transform_1, window_bounds = array<i64: 1, 64, 8>}, {pipeline_mode = #tpu.pipeline_mode<synchronous>, transform_indices = @transform_2, window_bounds = array<i64: 1, 8>}, {pipeline_mode = #tpu.pipeline_mode<synchronous>, transform_indices = @transform_3, window_bounds = array<i64: 1, 8, 64>}, {pipeline_mode = #tpu.pipeline_mode<synchronous>, transform_indices = @transform_4, window_bounds = array<i64: 1, 1, 64>}, {transform_indices = @transform_5, window_bounds = array<i64: 5, 64, 256>}]} {
    %c0 = arith.constant 0 : index
    %c0_0 = arith.constant 0 : index
    %c0_1 = arith.constant 0 : index
    %0 = vector.load %arg1[%c0, %c0_0, %c0_1] : memref<5x64x256xf32, #tpu.memory_space<vmem>>, vector<5x64x256xf32>
    %c0_2 = arith.constant 0 : index
    %c0_3 = arith.constant 0 : index
    %1 = vector.load %arg3[%c0_2, %c0_3] : memref<1x8xf32, #tpu.memory_space<vmem>>, vector<1x8xf32>
    %cst = arith.constant dense<0.000000e+00> : vector<5x64xf32>
    %2 = vector.multi_reduction <add>, %0, %cst [2] : vector<5x64x256xf32> to vector<5x64xf32>
    %cst_4 = arith.constant 3.906250e-03 : f32
    %3 = vector.broadcast %cst_4 : f32 to vector<5x64xf32>
    %4 = arith.mulf %2, %3 : vector<5x64xf32>
    %c0_5 = arith.constant 0 : index
    %c0_6 = arith.constant 0 : index
    %c0_7 = arith.constant 0 : index
    %5 = vector.load %arg2[%c0_5, %c0_6, %c0_7] : memref<1x64x8xf32, #tpu.memory_space<vmem>>, vector<1x64x8xf32>
    %6 = vector.shape_cast %5 : vector<1x64x8xf32> to vector<64x8xf32>
    %cst_8 = arith.constant dense<0.000000e+00> : vector<5x8xf32>
    %7 = tpu.matmul %4, %6, %cst_8 {dimension_numbers = #tpu.dot_dimension_numbers<[1], [0], [0], [1], [0, 0, 1, 1], [], []>} : vector<5x64xf32>, vector<64x8xf32>, vector<5x8xf32> -> vector<5x8xf32>
    %8 = vector.broadcast %1 : vector<1x8xf32> to vector<5x8xf32>
    %9 = arith.addf %8, %7 : vector<5x8xf32>
    %cst_9 = arith.constant 0.000000e+00 : f32
    %10 = vector.broadcast %cst_9 : f32 to vector<5x8xf32>
    %11 = arith.maximumf %9, %10 : vector<5x8xf32>
    %c0_10 = arith.constant 0 : index
    %c0_11 = arith.constant 0 : index
    %c0_12 = arith.constant 0 : index
    %12 = vector.load %arg4[%c0_10, %c0_11, %c0_12] : memref<1x8x64xf32, #tpu.memory_space<vmem>>, vector<1x8x64xf32>
    %13 = vector.shape_cast %12 : vector<1x8x64xf32> to vector<8x64xf32>
    %cst_13 = arith.constant dense<0.000000e+00> : vector<5x64xf32>
    %14 = tpu.matmul %11, %13, %cst_13 {dimension_numbers = #tpu.dot_dimension_numbers<[1], [0], [0], [1], [0, 0, 1, 1], [], []>} : vector<5x8xf32>, vector<8x64xf32>, vector<5x64xf32> -> vector<5x64xf32>
    %c0_14 = arith.constant 0 : index
    %c0_15 = arith.constant 0 : index
    %c0_16 = arith.constant 0 : index
    %15 = vector.load %arg5[%c0_14, %c0_15, %c0_16] : memref<1x1x64xf32, #tpu.memory_space<vmem>>, vector<1x1x64xf32>
    %16 = vector.shape_cast %15 : vector<1x1x64xf32> to vector<1x64xf32>
    %17 = vector.broadcast %16 : vector<1x64xf32> to vector<5x64xf32>
    %18 = arith.addf %14, %17 : vector<5x64xf32>
    %19 = arith.negf %18 : vector<5x64xf32>
    %20 = math.exp %19 : vector<5x64xf32>
    %cst_17 = arith.constant 1.000000e+00 : f32
    %21 = vector.broadcast %cst_17 : f32 to vector<5x64xf32>
    %22 = arith.addf %21, %20 : vector<5x64xf32>
    %23 = arith.divf %21, %22 : vector<5x64xf32>
    %24 = vector.shape_cast %23 : vector<5x64xf32> to vector<5x64x1xf32>
    %25 = vector.broadcast %24 : vector<5x64x1xf32> to vector<5x64x256xf32>
    %26 = arith.mulf %0, %25 : vector<5x64x256xf32>
    %c0_18 = arith.constant 0 : index
    %c0_19 = arith.constant 0 : index
    %c0_20 = arith.constant 0 : index
    %27 = vector.load %arg6[%c0_18, %c0_19, %c0_20] : memref<5x64x256xf32, #tpu.memory_space<vmem>>, vector<5x64x256xf32>
    tpu.vector_store %arg6[%c0_18, %c0_19, %c0_20], %26 {strides = array<i32>} : memref<5x64x256xf32, #tpu.memory_space<vmem>>, vector<5x64x256xf32>,
    return
  }
  func.func @transform_0(%arg0: i32) -> (i32, i32, i32) {
    %c0_i32 = arith.constant 0 : i32
    %c0_i32_0 = arith.constant 0 : i32
    %c0_i32_1 = arith.constant 0 : i32
    return %arg0, %c0_i32, %c0_i32_0 : i32, i32, i32
  }
  func.func @transform_1(%arg0: i32) -> (i32, i32, i32) {
    %c0_i32 = arith.constant 0 : i32
    %c0_i32_0 = arith.constant 0 : i32
    %c0_i32_1 = arith.constant 0 : i32
    %c0_i32_2 = arith.constant 0 : i32
    return %c0_i32, %c0_i32_0, %c0_i32_1 : i32, i32, i32
  }
  func.func @transform_2(%arg0: i32) -> (i32, i32) {
    %c0_i32 = arith.constant 0 : i32
    %c0_i32_0 = arith.constant 0 : i32
    %c0_i32_1 = arith.constant 0 : i32
    return %c0_i32, %c0_i32_0 : i32, i32
  }
  func.func @transform_3(%arg0: i32) -> (i32, i32, i32) {
    %c0_i32 = arith.constant 0 : i32
    %c0_i32_0 = arith.constant 0 : i32
    %c0_i32_1 = arith.constant 0 : i32
    %c0_i32_2 = arith.constant 0 : i32
    return %c0_i32, %c0_i32_0, %c0_i32_1 : i32, i32, i32
  }
  func.func @transform_4(%arg0: i32) -> (i32, i32, i32) {
    %c0_i32 = arith.constant 0 : i32
    %c0_i32_0 = arith.constant 0 : i32
    %c0_i32_1 = arith.constant 0 : i32
    %c0_i32_2 = arith.constant 0 : i32
    return %c0_i32, %c0_i32_0, %c0_i32_1 : i32, i32, i32
  }
  func.func @transform_5(%arg0: i32) -> (i32, i32, i32) {
    %c0_i32 = arith.constant 0 : i32
    %c0_i32_0 = arith.constant 0 : i32
    %c0_i32_1 = arith.constant 0 : i32
    return %arg0, %c0_i32, %c0_i32_0 : i32, i32, i32
  }
}

</mosaic_0001>

<bundles_post_ra>
// kernel: se_module_forward.1
= control target key start
LH: loop header
LB: loop body
LE: loop exit
PB: predicated region body
PF: predicated region fallthrough
CT: control target
= control target key end

     0   :  { %vm1110_vm0 = vmmov 0   ;;  %vm320_vm1 = vcmask 130112   ;;  %vm327_vm2 = vcmask 195712   ;;  %vm334_vm3 = vcmask 261312   ;;  %s2114_s0 = inlined_call_operand.vmem [shape: f32[5,64,256], index: 0, kind: input, shape index: {}]   ;;  %s2115_s1 = inlined_call_operand.vmem [shape: f32[1,64,8], index: 1, kind: input, shape index: {}]   ;;  %s2116_s3 = inlined_call_operand.vmem [shape: f32[1,8,64], index: 3, kind: input, shape index: {}]   ;;  %s2117_s2 = inlined_call_operand.vmem [shape: f32[1,8], index: 2, kind: input, shape index: {}]   ;;  %s2118_s4 = inlined_call_operand.vmem [shape: f32[1,1,64], index: 4, kind: input, shape index: {}]   ;;  %s2119_s5 = inlined_call_operand.vmem [shape: f32[5,64,256], index: 5, kind: output, shape index: {}]  }
   0x1   :  { %v1145_v0 = vld [vmem:[%s2114_s0 + $0x80] sm:$0xff]  ;;  %v1150_v1 = vld [vmem:[%s2114_s0 + $0x88] sm:$0xff]  ;;  %v1167_v5 = vld [vmem:[%s2114_s0 + $0x90] sm:$0xff]  ;;  %vm341_vm4 = vcmask 326912   ;;  %vm348_vm5 = vcmask 392512   ;;  %vm355_vm6 = vcmask 458112  }
   0x2   :  { %2173 = vst [vmem:[#allocation2_spill] sm:$0xff] %v1145_v0  ;;  %2174 = vst [vmem:[#allocation3_spill] sm:$0xff] %v1150_v1  ;;  %v1155_v2 = vld [vmem:[%s2114_s0] sm:$0xff]  ;;  %v125_v3 = vadd.f32 %v1150_v1, %v1145_v0  ;;  %v1162_v4 = vld [vmem:[%s2114_s0 + $0x8] sm:$0xff]  ;;  %vm362_vm7 = vcmask 523712   ;;  %vm520_vm8 = vcmask 1041409  }
   0x3   :  { %2175 = vst [vmem:[#allocation4_spill] sm:$0xff] %v1167_v5  ;;  %v1172_v6 = vld [vmem:[%s2114_s0 + $0x98] sm:$0xff]  ;;  %v101_v7 = vadd.f32 %v1162_v4, %v1155_v2  ;;  %v1179_v8 = vld [vmem:[%s2114_s0 + $0x10] sm:$0xff]  ;;  %v1193_v12 = vld [vmem:[%s2114_s0 + $0xa0] sm:$0xff]  ;;  %vm522_vm9 = vcmask 1042434   ;;  %vm524_vm10 = vcmask 1043459  }
   0x4   :  { %2176 = vst [vmem:[#allocation5_spill] sm:$0xff] %v1172_v6  ;;  %v1184_v9 = vld [vmem:[%s2114_s0 + $0x18] sm:$0xff]  ;;  %126 = vadd.xlane.f32.xlu1 %v125_v3  ;;  %v128_v10 = vadd.f32 %v1172_v6, %v1167_v5  ;;  %2177 = vst [vmem:[#allocation6_spill] sm:$0xff] %v1193_v12  ;;  %v1198_v13 = vld [vmem:[%s2114_s0 + $0xa8] sm:$0xff]  ;;  %vm526_vm11 = vcmask 1044484   ;;  %vm528_vm12 = vcmask 523264  }
   0x5   :  { %102 = vadd.xlane.f32.xlu0 %v101_v7  ;;  %v104_v11 = vadd.f32 %v1184_v9, %v1179_v8  ;;  %2178 = vst [vmem:[#allocation7_spill] sm:$0xff] %v1198_v13  ;;  %v1203_v14 = vld [vmem:[%s2114_s0 + $0x20] sm:$0xff]  ;;  %v1208_v15 = vld [vmem:[%s2114_s0 + $0x28] sm:$0xff]  ;;  %v131_v16 = vadd.f32 %v1198_v13, %v1193_v12  ;;  %v54_v18 = vld [vmem:[%s2114_s0 + $0x110] sm:$0xff]  ;;  %vm617_vm13 = vcmask 64512  }
   0x6   :  { %v107_v17 = vadd.f32 %v1208_v15, %v1203_v14  ;;  %v55_v19 = vld [vmem:[%s2114_s0 + $0x118] sm:$0xff]  ;;  %v1223_v20 = vld [vmem:[%s2114_s0 + $0x100] sm:$0xff]  ;;  %v1228_v21 = vld [vmem:[%s2114_s0 + $0x108] sm:$0xff] }
   0x7   :  { %2179 = vst [vmem:[#allocation8_spill] sm:$0xff] %v1223_v20  ;;  %2180 = vst [vmem:[#allocation9_spill] sm:$0xff] %v1228_v21  ;;  %v152_v22 = vadd.f32 %v55_v19, %v54_v18  ;;  %v149_v23 = vadd.f32 %v1228_v21, %v1223_v20  ;;  %v1235_v24 = vld [vmem:[%s2114_s0 + $0xb0] sm:$0xff]  ;;  %v1240_v25 = vld [vmem:[%s2114_s0 + $0xb8] sm:$0xff] }
   0x8   :  { %129 = vadd.xlane.f32.xlu1 %v128_v10  ;;  %2181 = vst [vmem:[#allocation10_spill] sm:$0xff] %v1235_v24  ;;  %2182 = vst [vmem:[#allocation11_spill] sm:$0xff] %v1240_v25  ;;  %v1245_v26 = vld [vmem:[%s2114_s0 + $0x30] sm:$0xff]  ;;  %v1250_v27 = vld [vmem:[%s2114_s0 + $0x38] sm:$0xff]  ;;  %v134_v28 = vadd.f32 %v1240_v25, %v1235_v24 }
   0x9   :  { %105 = vadd.xlane.f32.xlu0 %v104_v11  ;;  %v110_v29 = vadd.f32 %v1250_v27, %v1245_v26  ;;  %v68_v30 = vld [vmem:[%s2114_s0 + $0x180] sm:$0xff]  ;;  %v69_v31 = vld [vmem:[%s2114_s0 + $0x188] sm:$0xff]  ;;  %v70_v38 = vld [vmem:[%s2114_s0 + $0x190] sm:$0xff] }
   0xa   :  { %v1265_v32 = vld [vmem:[%s2114_s0 + $0x120] sm:$0xff]  ;;  %v1270_v33 = vld [vmem:[%s2114_s0 + $0x128] sm:$0xff]  ;;  %v173_v34 = vadd.f32 %v69_v31, %v68_v30  ;;  %v71_v39 = vld [vmem:[%s2114_s0 + $0x198] sm:$0xff] }
   0xb   :  { %2183 = vst [vmem:[#allocation12_spill] sm:$0xff] %v1265_v32  ;;  %2184 = vst [vmem:[#allocation13_spill] sm:$0xff] %v1270_v33  ;;  %v155_v35 = vadd.f32 %v1270_v33, %v1265_v32  ;;  %v1277_v36 = vld [vmem:[%s2114_s0 + $0x40] sm:$0xff]  ;;  %v1282_v37 = vld [vmem:[%s2114_s0 + $0x48] sm:$0xff]  ;;  %v176_v41 = vadd.f32 %v71_v39, %v70_v38 }
   0xc   :  { %132 = vadd.xlane.f32.xlu1 %v131_v16  ;;  %v113_v40 = vadd.f32 %v1282_v37, %v1277_v36  ;;  %v1295_v42 = vld [vmem:[%s2114_s0 + $0x130] sm:$0xff]  ;;  %v1300_v43 = vld [vmem:[%s2114_s0 + $0x138] sm:$0xff]  ;;  %v1305_v44 = vld [vmem:[%s2114_s0 + $0xc0] sm:$0xff] }
   0xd   :  { %108 = vadd.xlane.f32.xlu0 %v107_v17  ;;  %2185 = vst [vmem:[#allocation14_spill] sm:$0xff] %v1295_v42  ;;  %2186 = vst [vmem:[#allocation15_spill] sm:$0xff] %v1300_v43  ;;  %v1310_v45 = vld [vmem:[%s2114_s0 + $0xc8] sm:$0xff]  ;;  %v158_v46 = vadd.f32 %v1300_v43, %v1295_v42  ;;  %v84_v48 = vld [vmem:[%s2114_s0 + $0x200] sm:$0xff] }
   0xe   :  { %2187 = vst [vmem:[#allocation16_spill] sm:$0xff] %v1305_v44  ;;  %2188 = vst [vmem:[#allocation17_spill] sm:$0xff] %v1310_v45  ;;  %v137_v47 = vadd.f32 %v1310_v45, %v1305_v44  ;;  %v85_v49 = vld [vmem:[%s2114_s0 + $0x208] sm:$0xff]  ;;  %v1325_v50 = vld [vmem:[%s2114_s0 + $0x1a0] sm:$0xff] }
   0xf   :  { %2189 = vst [vmem:[#allocation18_spill] sm:$0xff] %v1325_v50  ;;  %v1330_v51 = vld [vmem:[%s2114_s0 + $0x1a8] sm:$0xff]  ;;  %v197_v52 = vadd.f32 %v85_v49, %v84_v48  ;;  %v1337_v54 = vld [vmem:[%s2114_s0 + $0x50] sm:$0xff]  ;;  %v1342_v55 = vld [vmem:[%s2114_s0 + $0x58] sm:$0xff] }
  0x10   :  { %153 = vadd.xlane.f32.xlu1 %v152_v22  ;;  %2190 = vst [vmem:[#allocation19_spill] sm:$0xff] %v1330_v51  ;;  %v179_v53 = vadd.f32 %v1330_v51, %v1325_v50  ;;  %2191 = vst [vmem:[#allocation20_spill] sm:$0xff] %v1342_v55  ;;  %v86_v56 = vld [vmem:[%s2114_s0 + $0x210] sm:$0xff]  ;;  %v87_v57 = vld [vmem:[%s2114_s0 + $0x218] sm:$0xff]  ;;  %v116_v58 = vadd.f32 %v1342_v55, %v1337_v54 }
  0x11   :  { %150 = vadd.xlane.f32.xlu0 %v149_v23  ;;  %v200_v59 = vadd.f32 %v87_v57, %v86_v56  ;;  %v1355_v60 = vld [vmem:[%s2114_s0 + $0x140] sm:$0xff]  ;;  %v1360_v61 = vld [vmem:[%s2114_s0 + $0x148] sm:$0xff]  ;;  %v1365_v62 = vld [vmem:[%s2114_s0 + $0xd0] sm:$0xff] }
  0x12   :  { %2192 = vst [vmem:[#allocation21_spill] sm:$0xff] %v1355_v60  ;;  %2193 = vst [vmem:[#allocation22_spill] sm:$0xff] %v1360_v61  ;;  %v1370_v63 = vld [vmem:[%s2114_s0 + $0xd8] sm:$0xff]  ;;  %v161_v3 = vadd.f32 %v1360_v61, %v1355_v60  ;;  %v88_v10 = vld [vmem:[%s2114_s0 + $0x220] sm:$0xff] }
  0x13   :  { %2194 = vst [vmem:[#allocation23_spill] sm:$0xff] %v1365_v62  ;;  %2195 = vst [vmem:[#allocation24_spill] sm:$0xff] %v1370_v63  ;;  %v140_v7 = vadd.f32 %v1370_v63, %v1365_v62  ;;  %v89_v11 = vld [vmem:[%s2114_s0 + $0x228] sm:$0xff]  ;;  %v1385_v16 = vld [vmem:[%s2114_s0 + $0x1b0] sm:$0xff] }
  0x14   :  { %135 = vadd.xlane.f32.xlu1 %v134_v28  ;;  %2196 = vst [vmem:[#allocation25_spill] sm:$0xff] %v1385_v16  ;;  %v1390_v17 = vld [vmem:[%s2114_s0 + $0x1b8] sm:$0xff]  ;;  %v203_v18 = vadd.f32 %v89_v11, %v88_v10  ;;  %v1397_v22 = vld [vmem:[%s2114_s0 + $0xe0] sm:$0xff]  ;;  %v1402_v23 = vld [vmem:[%s2114_s0 + $0xe8] sm:$0xff] }
  0x15   :  { %111 = vadd.xlane.f32.xlu0 %v110_v29  ;;  %2197 = vst [vmem:[#allocation26_spill] sm:$0xff] %v1390_v17  ;;  %v182_v19 = vadd.f32 %v1390_v17, %v1385_v16  ;;  %2198 = vst [vmem:[#allocation27_spill] sm:$0xff] %v1397_v22  ;;  %v1407_v28 = vld [vmem:[%s2114_s0 + $0x60] sm:$0xff]  ;;  %v1412_v29 = vld [vmem:[%s2114_s0 + $0x68] sm:$0xff]  ;;  %v143_v30 = vadd.f32 %v1402_v23, %v1397_v22 }
  0x16   :  { %2199 = vst [vmem:[#allocation28_spill] sm:$0xff] %v1402_v23  ;;  %v119_v31 = vadd.f32 %v1412_v29, %v1407_v28  ;;  %v1431_v38 = vld [vmem:[%s2114_s0 + $0x150] sm:$0xff]  ;;  %v1436_v39 = vld [vmem:[%s2114_s0 + $0x158] sm:$0xff]  ;;  %v1463_v56 = vld [vmem:[%s2114_s0 + $0x160] sm:$0xff] }
  0x17   :  { %2202 = vst [vmem:[#allocation31_spill] sm:$0xff] %v1431_v38  ;;  %2203 = vst [vmem:[#allocation32_spill] sm:$0xff] %v1436_v39  ;;  %v90_v48 = vld [vmem:[%s2114_s0 + $0x230] sm:$0xff]  ;;  %v91_v49 = vld [vmem:[%s2114_s0 + $0x238] sm:$0xff] }
  0x18   :  { %174 = vadd.xlane.f32.xlu1 %v173_v34  ;;  %v1421_v34 = vld [vmem:[%s2114_s0 + $0x1c0] sm:$0xff]  ;;  %2206 = vst [vmem:[#allocation35_spill] sm:$0xff] %v1463_v56  ;;  %v1468_v57 = vld [vmem:[%s2114_s0 + $0x168] sm:$0xff] }
  0x19   :  { %156 = vadd.xlane.f32.xlu0 %v155_v35  ;;  %2200 = vst [vmem:[#allocation29_spill] sm:$0xff] %v1421_v34  ;;  %v1426_v35 = vld [vmem:[%s2114_s0 + $0x1c8] sm:$0xff]  ;;  %2207 = vst [vmem:[#allocation36_spill] sm:$0xff] %v1468_v57  ;;  %v1487_v10 = vld [vmem:[%s2114_s0 + $0x240] sm:$0xff] }
  0x1a   :  { %2201 = vst [vmem:[#allocation30_spill] sm:$0xff] %v1426_v35  ;;  %2210 = vst [vmem:[#allocation39_spill] sm:$0xff] %v1487_v10  ;;  %v1492_v11 = vld [vmem:[%s2114_s0 + $0x248] sm:$0xff] }
  0x1b   :  { %2211 = vst [vmem:[#allocation40_spill] sm:$0xff] %v1492_v11 }
  0x1c   :  { %114 = vadd.xlane.f32.xlu1 %v113_v40  ;;  %v185_v40 = vadd.f32 %v1426_v35, %v1421_v34 }
  0x1d   :  { %177 = vadd.xlane.f32.xlu0 %v176_v41  ;;  %v164_v41 = vadd.f32 %v1436_v39, %v1431_v38 }
  0x20   :  { %159 = vadd.xlane.f32.xlu1 %v158_v46  ;;  %v1445_v46 = vld [vmem:[%s2114_s0 + $0x70] sm:$0xff] }
  0x21   :  { %138 = vadd.xlane.f32.xlu0 %v137_v47  ;;  %2204 = vst [vmem:[#allocation33_spill] sm:$0xff] %v1445_v46  ;;  %v1450_v47 = vld [vmem:[%s2114_s0 + $0x78] sm:$0xff] }
  0x22   :  { %2205 = vst [vmem:[#allocation34_spill] sm:$0xff] %v1450_v47 }
  0x24   :  { %198 = vadd.xlane.f32.xlu1 %v197_v52  ;;  %v122_v52 = vadd.f32 %v1450_v47, %v1445_v46 }
  0x25   :  { %180 = vadd.xlane.f32.xlu0 %v179_v53  ;;  %v206_v53 = vadd.f32 %v91_v49, %v90_v48  ;;  %v1521_v48 = vld [vmem:[%s2114_s0 + $0x170] sm:$0xff]  ;;  %v1526_v49 = vld [vmem:[%s2114_s0 + $0x178] sm:$0xff] }
  0x26   :  { %2216 = vst [vmem:[#allocation45_spill] sm:$0xff] %v1521_v48  ;;  %2217 = vst [vmem:[#allocation46_spill] sm:$0xff] %v1526_v49 }
  0x28   :  { %117 = vadd.xlane.f32.xlu1 %v116_v58  ;;  %v1473_v58 = vld [vmem:[%s2114_s0 + $0xf0] sm:$0xff] }
  0x29   :  { %201 = vadd.xlane.f32.xlu0 %v200_v59  ;;  %2208 = vst [vmem:[#allocation37_spill] sm:$0xff] %v1473_v58  ;;  %v1478_v59 = vld [vmem:[%s2114_s0 + $0xf8] sm:$0xff] }
  0x2a   :  { %2209 = vst [vmem:[#allocation38_spill] sm:$0xff] %v1478_v59 }
  0x2c   :  { %162 = vadd.xlane.f32.xlu1 %v161_v3  ;;  %v167_v3 = vadd.f32 %v1468_v57, %v1463_v56 }
  0x2d   :  { %141 = vadd.xlane.f32.xlu0 %v140_v7  ;;  %v146_v7 = vadd.f32 %v1478_v59, %v1473_v58 }
  0x30   :  { %204 = vadd.xlane.f32.xlu1 %v203_v18  ;;  %v1497_v18 = vld [vmem:[%s2114_s0 + $0x1d0] sm:$0xff] }
  0x31   :  { %183 = vadd.xlane.f32.xlu0 %v182_v19  ;;  %2212 = vst [vmem:[#allocation41_spill] sm:$0xff] %v1497_v18  ;;  %v1502_v19 = vld [vmem:[%s2114_s0 + $0x1d8] sm:$0xff] }
  0x32   :  { %2213 = vst [vmem:[#allocation42_spill] sm:$0xff] %v1502_v19 }
  0x34   :  { %144 = vadd.xlane.f32.xlu1 %v143_v30  ;;  %v209_v30 = vadd.f32 %v1492_v11, %v1487_v10 }
  0x35   :  { %120 = vadd.xlane.f32.xlu0 %v119_v31  ;;  %v188_v31 = vadd.f32 %v1502_v19, %v1497_v18  ;;  %v1559_v19 = vld [vmem:[%s2114_s0 + $0x270] sm:$0xff]  ;;  %v1564_v18 = vld [vmem:[%s2114_s0 + $0x278] sm:$0xff] }
  0x36   :  { %2222 = vst [vmem:[#allocation51_spill] sm:$0xff] %v1559_v19  ;;  %2223 = vst [vmem:[#allocation52_spill] sm:$0xff] %v1564_v18 }
  0x38   :  { %186 = vadd.xlane.f32.xlu1 %v185_v40  ;;  %v1511_v40 = vld [vmem:[%s2114_s0 + $0x1e0] sm:$0xff] }
  0x39   :  { %165 = vadd.xlane.f32.xlu0 %v164_v41  ;;  %2214 = vst [vmem:[#allocation43_spill] sm:$0xff] %v1511_v40  ;;  %v1516_v41 = vld [vmem:[%s2114_s0 + $0x1e8] sm:$0xff] }
  0x3a   :  { %2215 = vst [vmem:[#allocation44_spill] sm:$0xff] %v1516_v41 }
  0x3c   :  { %123 = vadd.xlane.f32.xlu1 %v122_v52  ;;  %v191_v52 = vadd.f32 %v1516_v41, %v1511_v40  ;;  %v1109_v40 = vmov 0.0|0.0  }
  0x3d   :  { %207 = vadd.xlane.f32.xlu0 %v206_v53  ;;  %v170_v53 = vadd.f32 %v1526_v49, %v1521_v48  ;;  %1076 = vmatprep.subr.bf16.mxu0 %v1109_v40 }
  0x40   :  { %168 = vadd.xlane.f32.xlu1 %v167_v3  ;;  %v1535_v3 = vld [vmem:[%s2114_s0 + $0x1f0] sm:$0xff] }
  0x41   :  { %147 = vadd.xlane.f32.xlu0 %v146_v7  ;;  %2218 = vst [vmem:[#allocation47_spill] sm:$0xff] %v1535_v3  ;;  %v1540_v7 = vld [vmem:[%s2114_s0 + $0x1f8] sm:$0xff] }
  0x42   :  { %2219 = vst [vmem:[#allocation48_spill] sm:$0xff] %v1540_v7  ;;  %v194_v11 = vadd.f32 %v1540_v7, %v1535_v3  ;;  %v261_v7 = vld [vmem:[%s2115_s1] sm:$0xff]  ;;  %v262_v3 = vld [vmem:[%s2115_s1 + $0x8] sm:$0xff] }
  0x43   :  { %v1077_v41 = vpack.c.bf16 %v262_v3, %v261_v7  ;;  %v267_v7 = vld [vmem:[%s2115_s1 + $0x30] sm:$0xff] }
  0x44   :  { %210 = vadd.xlane.f32.xlu1 %v209_v30  ;;  %v1545_v30 = vld [vmem:[%s2114_s0 + $0x250] sm:$0xff] }
  0x45   :  { %189 = vadd.xlane.f32.xlu0 %v188_v31  ;;  %2220 = vst [vmem:[#allocation49_spill] sm:$0xff] %v1545_v30  ;;  %v1550_v31 = vld [vmem:[%s2114_s0 + $0x258] sm:$0xff]  ;;  %1078 = vmatpush3.bf16.msra.mxu0 %v1077_v41  ;;  %v266_v41 = vld [vmem:[%s2115_s1 + $0x28] sm:$0xff] }
  0x46   :  { %2221 = vst [vmem:[#allocation50_spill] sm:$0xff] %v1550_v31  ;;  %v212_v10 = vadd.f32 %v1550_v31, %v1545_v30  ;;  %v218_v31 = vadd.f32 %v1564_v18, %v1559_v19  ;;  %1079 = vmatprep.subr.bf16.mxu0 %v1109_v40  ;;  %v309_v18 = vlaneseq }
  0x48   :  { %192 = vadd.xlane.f32.xlu1 %v191_v52  ;;  %v1569_v52 = vld [vmem:[%s2114_s0 + $0x260] sm:$0xff]  ;;  %v310_v19 = vand.u32 127, %v309_v18 }
  0x49   :  { %171 = vadd.xlane.f32.xlu0 %v170_v53  ;;  %2224 = vst [vmem:[#allocation53_spill] sm:$0xff] %v1569_v52  ;;  %v1574_v53 = vld [vmem:[%s2114_s0 + $0x268] sm:$0xff] }
  0x4a   :  { %2225 = vst [vmem:[#allocation54_spill] sm:$0xff] %v1574_v53  ;;  %v215_v30 = vadd.f32 %v1574_v53, %v1569_v52  ;;  %v322_v60 = vadd.s32 4294967280, %v310_v19  ;;  %v329_v33 = vadd.s32 4294967272, %v310_v19  ;;  %v336_v32 = vadd.s32 4294967264, %v310_v19 }
  0x4b   :  { %v343_v59 = vadd.s32 4294967256, %v310_v19  ;;  %v350_v20 = vadd.s32 4294967248, %v310_v19  ;;  %v357_v22 = vadd.s32 4294967240, %v310_v19 }
  0x4c   :  { %195 = vadd.xlane.f32.xlu1 %v194_v11  ;;  %v264_v11 = vld [vmem:[%s2115_s1 + $0x18] sm:$0xff] }
  0x4d   :  { %213 = vadd.xlane.f32.xlu0 %v212_v10  ;;  %v263_v10 = vld [vmem:[%s2115_s1 + $0x10] sm:$0xff] }
  0x50   :  { %219 = vadd.xlane.f32.xlu1 %v218_v31  ;;  %v265_v31 = vld [vmem:[%s2115_s1 + $0x20] sm:$0xff] }
  0x51   :  { %216 = vadd.xlane.f32.xlu0 %v215_v30  ;;  %v1080_v30 = vpack.c.bf16 %v264_v11, %v263_v10  ;;  %v1083_v3 = vpack.c.bf16 %v266_v41, %v265_v31  ;;  %v268_v10 = vld [vmem:[%s2115_s1 + $0x38] sm:$0xff]  ;;  %v1604_v31 = vshrl.u32 %v309_v18, 7  ;;  %v315_v41 = vadd.s32 4294967288, %v310_v19 }
  0x52   :  { %v1086_v11 = vpack.c.bf16 %v268_v10, %v267_v7 }
  0x53   :  { %1081 = vmatpush3.bf16.msra.mxu0 %v1080_v30  ;;  %v1111_v30 = vmov 0.0   ;;  %v1607_v53 = vsub.s32 %v310_v19, %v1604_v31  ;;  %v1610_v17 = vsub.s32 %v315_v41, %v1604_v31  ;;  %v1640_v62 = vsub.s32 %v322_v60, %v1604_v31 }
  0x54   :  { %1082 = vmatprep.subr.bf16.mxu0 %v1109_v40  ;;  %1068 = vmatprep.mubr.msk.f32.mxu0 %vm1110_vm0, %v1111_v30  ;;  %v1643_v45 = vsub.s32 %v329_v33, %v1604_v31  ;;  %v1646_v44 = vsub.s32 %v336_v32, %v1604_v31  ;;  %v1655_v19 = vsub.s32 %v350_v20, %v1604_v31 }
  0x55   :  { %1071 = vmatprep.subr.mxu1 %v1111_v30  ;;  %1073 = vmatprep.mubr.msk.f32.mxu1 %vm1110_vm0, %v1111_v30  ;;  %v1661_v32 = vsub.s32 %v357_v22, %v1604_v31 }
  0x57   :  { %1084 = vmatpush3.bf16.msra.mxu0 %v1083_v3 }
  0x58   :  { %1085 = vmatprep.subr.bf16.mxu0 %v1109_v40 }
  0x5b   :  { %1087 = vmatpush3.bf16.msra.mxu0 %v1086_v11 }
  0x91   :  { %v127_v40 = vpop.xlane.xlu1 %126 }
  0x92   :  { %v103_v3 = vpop.xlane.xlu0 %102  ;;  %v229_v25 = vmul.f32 0.00390625, %v127_v40 }
  0x93   :  { %v221_v52 = vmul.f32 0.00390625, %v103_v3 }
  0x95   :  { %v130_v7 = vpop.xlane.xlu1 %129  ;;  %v314_v30 = vrot.slane %v221_v52, %v1607_v53 }
  0x96   :  { %v106_v10 = vpop.xlane.xlu0 %105  ;;  %v230_v21 = vmul.f32 0.00390625, %v130_v7  ;;  %v1649_v7 = vsub.s32 %v343_v59, %v1604_v31  ;;  %v367_v59 = vrot.slane %v229_v25, %v1607_v53 }
  0x97   :  { %v222_v11 = vmul.f32 0.00390625, %v106_v10 }
  0x98   :  { %v371_v60 = vrot.slane %v230_v21, %v1610_v17 }
  0x99   :  { %v319_v16 = vrot.slane %v222_v11, %v1610_v17  ;;  %v133_v18 = vpop.xlane.xlu1 %132 }
  0x9a   :  { %v109_v35 = vpop.xlane.xlu0 %108  ;;  %v231_v23 = vmul.f32 0.00390625, %v133_v18  ;;  %v372_v46 = vsel %vm320_vm1, %v371_v60, %v367_v59 }
  0x9b   :  { %v1615_v34 = vsel %vm320_vm1, %v319_v16, %v314_v30  ;;  %v223_v24 = vmul.f32 0.00390625, %v109_v35 }
  0x9c   :  { %v376_v33 = vrot.slane %v231_v23, %v1640_v62 }
  0x9d   :  { %v154_v51 = vpop.xlane.xlu1 %153  ;;  %v326_v5 = vrot.slane %v223_v24, %v1640_v62 }
  0x9e   :  { %v1617_v50 = vpop.xlane.xlu0 %150  ;;  %v377_v22 = vsel %vm327_vm2, %v376_v33, %v372_v46 }
  0x9f   :  { %v328_v24 = vsel %vm327_vm2, %v326_v5, %v1615_v34 }
  0xa1   :  { %v136_v3 = vpop.xlane.xlu1 %135 }
  0xa2   :  { %v112_v49 = vpop.xlane.xlu0 %111  ;;  %v232_v18 = vmul.f32 0.00390625, %v136_v3  ;;  %v238_v3 = vmul.f32 0.00390625, %v154_v51 }
  0xa3   :  { %v224_v40 = vmul.f32 0.00390625, %v112_v49 }
  0xa4   :  { %v381_v23 = vrot.slane %v232_v18, %v1643_v45 }
  0xa5   :  { %v1619_v41 = vpop.xlane.xlu1 %174  ;;  %v333_v25 = vrot.slane %v224_v40, %v1643_v45 }
  0xa6   :  { %v1621_v48 = vpop.xlane.xlu0 %156  ;;  %v382_v60 = vsel %vm334_vm3, %v381_v23, %v377_v22 }
  0xa7   :  { %v335_v34 = vsel %vm334_vm3, %v333_v25, %v328_v24 }
  0xa9   :  { %v115_v10 = vpop.xlane.xlu1 %114 }
  0xaa   :  { %v1623_v39 = vpop.xlane.xlu0 %177  ;;  %v225_v13 = vmul.f32 0.00390625, %v115_v10 }
  0xab   :  { %v246_v18 = vmul.f32 0.00390625, %v1623_v39 }
  0xac   :  { %v340_v51 = vrot.slane %v225_v13, %v1646_v44 }
  0xad   :  { %v1625_v52 = vpop.xlane.xlu1 %159 }
  0xae   :  { %v139_v11 = vpop.xlane.xlu0 %138  ;;  %v240_v33 = vmul.f32 0.00390625, %v1625_v52  ;;  %v342_v59 = vsel %vm341_vm4, %v340_v51, %v335_v34 }
  0xaf   :  { %v233_v21 = vmul.f32 0.00390625, %v139_v11  ;;  %v410_v11 = vrot.slane %v238_v3, %v1610_v17 }
  0xb0   :  { %v420_v25 = vrot.slane %v240_v33, %v1643_v45 }
  0xb1   :  { %v1627_v38 = vpop.xlane.xlu1 %198  ;;  %v386_v10 = vrot.slane %v233_v21, %v1646_v44 }
  0xb2   :  { %v1629_v57 = vpop.xlane.xlu0 %180 }
  0xb3   :  { %v387_v39 = vsel %vm341_vm4, %v386_v10, %v382_v60  ;;  %v247_v23 = vmul.f32 0.00390625, %v1629_v57 }
  0xb5   :  { %v118_v16 = vpop.xlane.xlu1 %117 }
  0xb6   :  { %v1631_v30 = vpop.xlane.xlu0 %201  ;;  %v226_v12 = vmul.f32 0.00390625, %v118_v16 }
  0xb9   :  { %v1633_v56 = vpop.xlane.xlu1 %162 }
  0xba   :  { %v142_v43 = vpop.xlane.xlu0 %141  ;;  %v241_v60 = vmul.f32 0.00390625, %v1633_v56 }
  0xbb   :  { %v234_v47 = vmul.f32 0.00390625, %v142_v43  ;;  %v237_v43 = vmul.f32 0.00390625, %v1617_v50 }
  0xbd   :  { %v1635_v42 = vpop.xlane.xlu1 %204  ;;  %v391_v46 = vrot.slane %v234_v47, %v1649_v7  ;;  %v245_v47 = vmul.f32 0.00390625, %v1619_v41 }
  0xbe   :  { %v1637_v61 = vpop.xlane.xlu0 %183 }
  0xbf   :  { %v392_v3 = vsel %vm348_vm5, %v391_v46, %v387_v39  ;;  %v445_v10 = vrot.slane %v245_v47, %v1607_v53  ;;  %v253_v46 = vmul.f32 0.00390625, %v1627_v38  ;;  %v425_v39 = vrot.slane %v241_v60, %v1646_v44 }
  0xc1   :  { %v145_v58 = vpop.xlane.xlu1 %144 }
  0xc2   :  { %v121_v63 = vpop.xlane.xlu0 %120  ;;  %v235_v49 = vmul.f32 0.00390625, %v145_v58  ;;  %v347_v58 = vrot.slane %v226_v12, %v1649_v7  ;;  %v406_v12 = vrot.slane %v237_v43, %v1607_v53 }
  0xc3   :  { %v227_v1 = vmul.f32 0.00390625, %v121_v63  ;;  %v239_v63 = vmul.f32 0.00390625, %v1621_v48 }
  0xc4   :  { %v396_v5 = vrot.slane %v235_v49, %v1655_v19  ;;  %v411_v51 = vsel %vm320_vm1, %v410_v11, %v406_v12  ;;  %v454_v11 = vrot.slane %v247_v23, %v1640_v62 }
  0xc5   :  { %v1651_v6 = vpop.xlane.xlu1 %186  ;;  %v354_v50 = vrot.slane %v227_v1, %v1655_v19  ;;  %v415_v21 = vrot.slane %v239_v63, %v1640_v62  ;;  %v349_v1 = vsel %vm348_vm5, %v347_v58, %v342_v59  ;;  %v254_v63 = vmul.f32 0.00390625, %v1631_v30 }
  0xc6   :  { %v1657_v35 = vpop.xlane.xlu0 %165  ;;  %v397_v49 = vsel %vm355_vm6, %v396_v5, %v392_v3  ;;  %v484_v59 = vrot.slane %v253_v46, %v1607_v53 }
  0xc7   :  { %v356_v41 = vsel %vm355_vm6, %v354_v50, %v349_v1  ;;  %v416_v57 = vsel %vm327_vm2, %v415_v21, %v411_v51  ;;  %v242_v30 = vmul.f32 0.00390625, %v1657_v35  ;;  %v488_v56 = vrot.slane %v254_v63, %v1610_v17 }
  0xc8   :  { %v421_v33 = vsel %vm334_vm3, %v420_v25, %v416_v57 }
  0xc9   :  { %v124_v20 = vpop.xlane.xlu1 %123  ;;  %v489_v23 = vsel %vm320_vm1, %v488_v56, %v484_v59 }
  0xca   :  { %v208_v0 = vpop.xlane.xlu0 %207  ;;  %v228_v55 = vmul.f32 0.00390625, %v124_v20 }
  0xcb   :  { %v256_v12 = vmul.f32 0.00390625, %v208_v0 }
  0xcc   :  { %v361_v48 = vrot.slane %v228_v55, %v1661_v32  ;;  %v449_v55 = vrot.slane %v246_v18, %v1610_v17  ;;  %v248_v18 = vmul.f32 0.00390625, %v1637_v61 }
  0xcd   :  { %v169_v16 = vpop.xlane.xlu1 %168 }
  0xce   :  { %v148_v13 = vpop.xlane.xlu0 %147  ;;  %v363_v24 = vsel %vm362_vm7, %v361_v48, %v356_v41  ;;  %v450_v50 = vsel %vm320_vm1, %v449_v55, %v445_v10  ;;  %v255_v48 = vmul.f32 0.00390625, %v1635_v42 }
  0xcf   :  { %v236_v40 = vmul.f32 0.00390625, %v148_v13  ;;  %v249_v13 = vmul.f32 0.00390625, %v1651_v6  ;;  %v459_v6 = vrot.slane %v248_v18, %v1643_v45  ;;  %v455_v1 = vsel %vm327_vm2, %v454_v11, %v450_v50 }
  0xd0   :  { %v493_v0 = vrot.slane %v255_v48, %v1640_v62 }
  0xd1   :  { %v401_v20 = vrot.slane %v236_v40, %v1661_v32  ;;  %v211_v52 = vpop.xlane.xlu1 %210  ;;  %v243_v40 = vmul.f32 0.00390625, %v169_v16  ;;  %v464_v42 = vrot.slane %v249_v13, %v1646_v44  ;;  %v430_v16 = vrot.slane %v242_v30, %v1649_v7 }
  0xd2   :  { %v190_v22 = vpop.xlane.xlu0 %189  ;;  %v257_v35 = vmul.f32 0.00390625, %v211_v52  ;;  %v498_v52 = vrot.slane %v256_v12, %v1643_v45  ;;  %v460_v25 = vsel %vm334_vm3, %v459_v6, %v455_v1  ;;  %v494_v46 = vsel %vm327_vm2, %v493_v0, %v489_v23  ;;  %v609_v12 = vld [vmem:[%s2116_s3] sm:$0xff] }
  0xd3   :  { %v402_v43 = vsel %vm362_vm7, %v401_v20, %v397_v49  ;;  %v250_v38 = vmul.f32 0.00390625, %v190_v22  ;;  %v435_v20 = vrot.slane %v243_v40, %v1655_v19  ;;  %v426_v22 = vsel %vm341_vm4, %v425_v39, %v421_v33  ;;  %1072 = vmatpush3.msra.mxu1 %v609_v12  ;;  %v1038_v39 = vld [vmem:[%s2118_s4] ss:$0 sm:$0xff] }
  0xd4   :  { %v1704_v58 = vsel %vm520_vm8, %v402_v43, %v363_v24  ;;  %v503_v24 = vrot.slane %v257_v35, %v1646_v44  ;;  %v465_v51 = vsel %vm341_vm4, %v464_v42, %v460_v25  ;;  %v431_v10 = vsel %vm348_vm5, %v430_v16, %v426_v22 }
  0xd5   :  { %v193_v5 = vpop.xlane.xlu1 %192  ;;  %v469_v53 = vrot.slane %v250_v38, %v1649_v7  ;;  %v436_v60 = vsel %vm355_vm6, %v435_v20, %v431_v10  ;;  %v499_v44 = vsel %vm334_vm3, %v498_v52, %v494_v46  ;;  %v734_v20 = vsub.s32 1, %v1604_v31 }
  0xd6   :  { %v172_v34 = vpop.xlane.xlu0 %171  ;;  %v251_v61 = vmul.f32 0.00390625, %v193_v5  ;;  %v504_v30 = vsel %vm341_vm4, %v503_v24, %v499_v44  ;;  %v804_v52 = vsub.s32 3, %v1604_v31 }
  0xd7   :  { %v244_v47 = vmul.f32 0.00390625, %v172_v34  ;;  %v470_v18 = vsel %vm348_vm5, %v469_v53, %v465_v51 }
  0xd8   :  { %v474_v49 = vrot.slane %v251_v61, %v1655_v19 }
  0xd9   :  { %v196_v21 = vpop.xlane.xlu1 %195  ;;  %v440_v41 = vrot.slane %v244_v47, %v1661_v32 }
  0xda   :  { %v252_v3 = vmul.f32 0.00390625, %v196_v21  ;;  %v214_v17 = vpop.xlane.xlu0 %213  ;;  %v475_v50 = vsel %vm355_vm6, %v474_v49, %v470_v18 }
  0xdb   :  { %v258_v55 = vmul.f32 0.00390625, %v214_v17  ;;  %v441_v11 = vsel %vm362_vm7, %v440_v41, %v436_v60  ;;  %v839_v41 = vsub.s32 4, %v1604_v31  ;;  %v2227_v60 = vld [vmem:[#allocation2_spill] sm:$0xff] }
  0xdc   :  { %v479_v62 = vrot.slane %v252_v3, %v1661_v32  ;;  %v523_v40 = vsel %vm522_vm9, %v441_v11, %v1704_v58  ;;  %v699_v3 = vsub.s32 0, %v1604_v31  ;;  %v2229_v11 = vld [vmem:[#allocation33_spill] sm:$0xff] }
  0xdd   :  { %v220_v43 = vpop.xlane.xlu1 %219  ;;  %v508_v63 = vrot.slane %v258_v55, %v1649_v7  ;;  %v769_v55 = vsub.s32 2, %v1604_v31 }
  0xde   :  { %v217_v45 = vpop.xlane.xlu0 %216  ;;  %v260_v57 = vmul.f32 0.00390625, %v220_v43  ;;  %v480_v7 = vsel %vm362_vm7, %v479_v62, %v475_v50 }
  0xdf   :  { %v259_v5 = vmul.f32 0.00390625, %v217_v45  ;;  %v509_v33 = vsel %vm348_vm5, %v508_v63, %v504_v30  ;;  %v525_v56 = vsel %vm524_vm10, %v480_v7, %v523_v40  ;;  %v2230_v30 = vld [vmem:[#allocation34_spill] sm:$0xff] }
  0xe0   :  { %v518_v13 = vrot.slane %v260_v57, %v1661_v32 }
  0xe1   :  { %v513_v34 = vrot.slane %v259_v5, %v1655_v19  ;;  %v1037_v19 = vld [vmem:[%s2117_s2] ss:$0 sm:$0xff]  ;;  %v2228_v5 = vld [vmem:[#allocation3_spill] sm:$0xff] }
  0xe3   :  { %v514_v48 = vsel %vm355_vm6, %v513_v34, %v509_v33  ;;  %v2231_v34 = vld [vmem:[#allocation6_spill] sm:$0xff] }
  0xe4   :  { %v519_v38 = vsel %vm362_vm7, %v518_v13, %v514_v48  ;;  %v2232_v48 = vld [vmem:[#allocation7_spill] sm:$0xff] }
  0xe5   :  { %v527_v32 = vsel %vm526_vm11, %v519_v38, %v525_v56 }
  0xe6   :  { %1069 = vmatmul.mubr.msk.f32.vlgmr.msra.gmra.mrb[0].mxu0 %vm528_vm12, %v527_v32  ;;  %v2233_v32 = vld [vmem:[#allocation4_spill] sm:$0xff] }
 0x1b9   :  { %v597_v61 = vpop.f32.mrb[0].mxu0 }
 0x1ba   :  { %v607_v47 = vadd.f32 %v1037_v19, %v597_v61  ;;  %v1070_v59 = vpop.f32.mrb[1].mxu0  ;;  %v2234_v19 = vld [vmem:[#allocation5_spill] sm:$0xff] }
 0x1bc   :  { %v608_v58 = vmax.f32 %v607_v47, 0.0  ;;  %v2235_v47 = vld [vmem:[#allocation16_spill] sm:$0xff] }
 0x1be   :  { %1074 = vmatmul.mubr.msk.f32.vlgmr.msra.gmra.mrb[0].mxu1 %vm617_vm13, %v608_v58  ;;  %v2236_v58 = vld [vmem:[#allocation17_spill] sm:$0xff] }
 0x291   :  { %v687_v6 = vpop.f32.mrb[0].mxu1 }
 0x292   :  { %v688_v35 = vadd.f32 %v1038_v39, %v687_v6  ;;  %v1075_v21 = vpop.f32.mrb[1].mxu1 }
 0x293   :  { %v2237_v21 = vld [vmem:[#allocation10_spill] sm:$0xff] }
 0x294   :  { %v1040_v1 = vmul.f32 -1.442695, %v688_v35 }
 0x296   :  { %1091 = vpow2.f32 %v1040_v1 }
 0x2a0   :  { %v1092_v42 = vpop.eup %1091 }
 0x2a1   :  { %v694_v16 = vadd.f32 1.0, %v1092_v42  ;;  %v2238_v42 = vld [vmem:[#allocation11_spill] sm:$0xff] }
 0x2a3   :  { %1093 = vrcp.f32 %v694_v16 }
 0x2ad   :  { %v1094_v17 = vpop.eup %1093 }
 0x2ae   :  { %v700_v0 = vrot.slane %v1094_v17, %v699_v3  ;;  %v735_v53 = vrot.slane %v1094_v17, %v734_v20  ;;  %v770_v23 = vrot.slane %v1094_v17, %v769_v55  ;;  %v805_v49 = vrot.slane %v1094_v17, %v804_v52  ;;  %v2239_v3 = vld [vmem:[#allocation27_spill] sm:$0xff] }
 0x2af   :  { %v840_v22 = vrot.slane %v1094_v17, %v839_v41 }
 0x2b0   :  { %706 = vbcast.lane.b32.xlu1 %v700_v0, 264  ;;  %702 = vbcast.lane.b32.xlu0 %v700_v0, 256 }
 0x2b4   :  { %710 = vbcast.lane.b32.xlu1 %v700_v0, 272  ;;  %718 = vbcast.lane.b32.xlu0 %v700_v0, 288 }
 0x2b8   :  { %714 = vbcast.lane.b32.xlu1 %v700_v0, 280  ;;  %726 = vbcast.lane.b32.xlu0 %v700_v0, 304 }
 0x2bc   :  { %722 = vbcast.lane.b32.xlu1 %v700_v0, 296  ;;  %737 = vbcast.lane.b32.xlu0 %v735_v53, 256 }
 0x2c0   :  { %730 = vbcast.lane.b32.xlu1 %v700_v0, 312  ;;  %745 = vbcast.lane.b32.xlu0 %v735_v53, 272  ;;  %v2240_v0 = vld [vmem:[#allocation28_spill] sm:$0xff] }
 0x2c4   :  { %741 = vbcast.lane.b32.xlu1 %v735_v53, 264  ;;  %753 = vbcast.lane.b32.xlu0 %v735_v53, 288 }
 0x2c8   :  { %749 = vbcast.lane.b32.xlu1 %v735_v53, 280  ;;  %761 = vbcast.lane.b32.xlu0 %v735_v53, 304 }
 0x2cc   :  { %757 = vbcast.lane.b32.xlu1 %v735_v53, 296  ;;  %772 = vbcast.lane.b32.xlu0 %v770_v23, 256 }
 0x2d0   :  { %765 = vbcast.lane.b32.xlu1 %v735_v53, 312  ;;  %780 = vbcast.lane.b32.xlu0 %v770_v23, 272 }
 0x2d4   :  { %776 = vbcast.lane.b32.xlu1 %v770_v23, 264  ;;  %788 = vbcast.lane.b32.xlu0 %v770_v23, 288 }
 0x2d8   :  { %784 = vbcast.lane.b32.xlu1 %v770_v23, 280  ;;  %796 = vbcast.lane.b32.xlu0 %v770_v23, 304 }
 0x2dc   :  { %792 = vbcast.lane.b32.xlu1 %v770_v23, 296  ;;  %807 = vbcast.lane.b32.xlu0 %v805_v49, 256 }
 0x2e0   :  { %800 = vbcast.lane.b32.xlu1 %v770_v23, 312  ;;  %815 = vbcast.lane.b32.xlu0 %v805_v49, 272  ;;  %v2241_v23 = vld [vmem:[#allocation23_spill] sm:$0xff] }
 0x2e4   :  { %811 = vbcast.lane.b32.xlu1 %v805_v49, 264  ;;  %823 = vbcast.lane.b32.xlu0 %v805_v49, 288 }
 0x2e8   :  { %819 = vbcast.lane.b32.xlu1 %v805_v49, 280  ;;  %831 = vbcast.lane.b32.xlu0 %v805_v49, 304 }
 0x2ec   :  { %827 = vbcast.lane.b32.xlu1 %v805_v49, 296  ;;  %842 = vbcast.lane.b32.xlu0 %v840_v22, 256 }
 0x2f0   :  { %835 = vbcast.lane.b32.xlu1 %v805_v49, 312  ;;  %850 = vbcast.lane.b32.xlu0 %v840_v22, 272  ;;  %v2242_v49 = vld [vmem:[#allocation24_spill] sm:$0xff] }
 0x2f4   :  { %846 = vbcast.lane.b32.xlu1 %v840_v22, 264  ;;  %858 = vbcast.lane.b32.xlu0 %v840_v22, 288 }
 0x2f8   :  { %854 = vbcast.lane.b32.xlu1 %v840_v22, 280  ;;  %866 = vbcast.lane.b32.xlu0 %v840_v22, 304 }
 0x2fc   :  { %862 = vbcast.lane.b32.xlu1 %v840_v22, 296 }
 0x300   :  { %870 = vbcast.lane.b32.xlu1 %v840_v22, 312  ;;  %v2243_v22 = vld [vmem:[#allocation8_spill] sm:$0xff] }
 0x322   :  { %v707_v25 = vpop.permute.xlu1 %706  ;;  %v703_v24 = vpop.permute.xlu0 %702 }
 0x323   :  { %v874_v62 = vmul.f32 %v707_v25, %v1179_v8  ;;  %v875_v43 = vmul.f32 %v707_v25, %v1184_v9  ;;  %v872_v31 = vmul.f32 %v703_v24, %v1155_v2  ;;  %v873_v51 = vmul.f32 %v703_v24, %v1162_v4  ;;  %v2244_v24 = vld [vmem:[#allocation9_spill] sm:$0xff] }
 0x325   :  { %954 = vst [vmem:[%s2119_s5 + $0x10] sm:$0xff] %v874_v62  ;;  %955 = vst [vmem:[%s2119_s5 + $0x18] sm:$0xff] %v875_v43 }
 0x326   :  { %952 = vst [vmem:[%s2119_s5] sm:$0xff] %v872_v31  ;;  %953 = vst [vmem:[%s2119_s5 + $0x8] sm:$0xff] %v873_v51  ;;  %v711_v8 = vpop.permute.xlu1 %710  ;;  %v719_v2 = vpop.permute.xlu0 %718  ;;  %v2245_v51 = vld [vmem:[#allocation37_spill] sm:$0xff] }
 0x327   :  { %v876_v4 = vmul.f32 %v711_v8, %v1203_v14  ;;  %v877_v9 = vmul.f32 %v711_v8, %v1208_v15  ;;  %v880_v10 = vmul.f32 %v719_v2, %v1277_v36  ;;  %v881_v63 = vmul.f32 %v719_v2, %v1282_v37  ;;  %v2246_v2 = vld [vmem:[#allocation38_spill] sm:$0xff] }
 0x329   :  { %956 = vst [vmem:[%s2119_s5 + $0x20] sm:$0xff] %v876_v4  ;;  %957 = vst [vmem:[%s2119_s5 + $0x28] sm:$0xff] %v877_v9  ;;  %v2247_v9 = vld [vmem:[#allocation12_spill] sm:$0xff] }
 0x32a   :  { %960 = vst [vmem:[%s2119_s5 + $0x40] sm:$0xff] %v880_v10  ;;  %961 = vst [vmem:[%s2119_s5 + $0x48] sm:$0xff] %v881_v63  ;;  %v715_v14 = vpop.permute.xlu1 %714  ;;  %v727_v15 = vpop.permute.xlu0 %726  ;;  %v2248_v63 = vld [vmem:[#allocation13_spill] sm:$0xff] }
 0x32b   :  { %v878_v36 = vmul.f32 %v715_v14, %v1245_v26  ;;  %v879_v37 = vmul.f32 %v715_v14, %v1250_v27  ;;  %v884_v45 = vmul.f32 %v727_v15, %v1407_v28  ;;  %v885_v57 = vmul.f32 %v727_v15, %v1412_v29  ;;  %v2226_v29 = vld [vmem:[#allocation20_spill] sm:$0xff] }
 0x32d   :  { %958 = vst [vmem:[%s2119_s5 + $0x30] sm:$0xff] %v878_v36  ;;  %959 = vst [vmem:[%s2119_s5 + $0x38] sm:$0xff] %v879_v37  ;;  %v1095_v37 = vld [vmem:[%s2114_s0 + $0x110] sm:$0xff] }
 0x32e   :  { %964 = vst [vmem:[%s2119_s5 + $0x60] sm:$0xff] %v884_v45  ;;  %965 = vst [vmem:[%s2119_s5 + $0x68] sm:$0xff] %v885_v57  ;;  %v723_v26 = vpop.permute.xlu1 %722  ;;  %v738_v27 = vpop.permute.xlu0 %737  ;;  %v1096_v57 = vld [vmem:[%s2114_s0 + $0x118] sm:$0xff] }
 0x32f   :  { %v882_v28 = vmul.f32 %v723_v26, %v1337_v54  ;;  %v883_v46 = vmul.f32 %v723_v26, %v2226_v29  ;;  %v888_v18 = vmul.f32 %v738_v27, %v2227_v60  ;;  %v889_v44 = vmul.f32 %v738_v27, %v2228_v5  ;;  %v2249_v27 = vld [vmem:[#allocation21_spill] sm:$0xff]  ;;  %v2250_v29 = vld [vmem:[#allocation22_spill] sm:$0xff] }
 0x330   :  { %v2251_v5 = vld [vmem:[#allocation14_spill] sm:$0xff] }
 0x331   :  { %962 = vst [vmem:[%s2119_s5 + $0x50] sm:$0xff] %v882_v28  ;;  %963 = vst [vmem:[%s2119_s5 + $0x58] sm:$0xff] %v883_v46 }
 0x332   :  { %968 = vst [vmem:[%s2119_s5 + $0x80] sm:$0xff] %v888_v18  ;;  %969 = vst [vmem:[%s2119_s5 + $0x88] sm:$0xff] %v889_v44  ;;  %v731_v54 = vpop.permute.xlu1 %730  ;;  %v746_v50 = vpop.permute.xlu0 %745 }
 0x333   :  { %v886_v13 = vmul.f32 %v731_v54, %v2229_v11  ;;  %v887_v7 = vmul.f32 %v731_v54, %v2230_v30  ;;  %v892_v33 = vmul.f32 %v746_v50, %v2231_v34  ;;  %v893_v40 = vmul.f32 %v746_v50, %v2232_v48  ;;  %v2252_v54 = vld [vmem:[#allocation15_spill] sm:$0xff]  ;;  %v2254_v30 = vld [vmem:[#allocation36_spill] sm:$0xff] }
 0x334   :  { %v2253_v11 = vld [vmem:[#allocation35_spill] sm:$0xff] }
 0x335   :  { %966 = vst [vmem:[%s2119_s5 + $0x70] sm:$0xff] %v886_v13  ;;  %967 = vst [vmem:[%s2119_s5 + $0x78] sm:$0xff] %v887_v7  ;;  %v2255_v48 = vld [vmem:[#allocation31_spill] sm:$0xff] }
 0x336   :  { %972 = vst [vmem:[%s2119_s5 + $0xa0] sm:$0xff] %v892_v33  ;;  %973 = vst [vmem:[%s2119_s5 + $0xa8] sm:$0xff] %v893_v40  ;;  %v742_v38 = vpop.permute.xlu1 %741  ;;  %v754_v56 = vpop.permute.xlu0 %753 }
 0x337   :  { %v890_v12 = vmul.f32 %v742_v38, %v2233_v32  ;;  %v891_v61 = vmul.f32 %v742_v38, %v2234_v19  ;;  %v896_v59 = vmul.f32 %v754_v56, %v2235_v47  ;;  %v897_v39 = vmul.f32 %v754_v56, %v2236_v58  ;;  %v2256_v38 = vld [vmem:[#allocation32_spill] sm:$0xff]  ;;  %v1097_v32 = vld [vmem:[%s2114_s0 + $0x180] sm:$0xff]  ;;  %v1098_v19 = vld [vmem:[%s2114_s0 + $0x188] sm:$0xff] }
 0x338   :  { %v2257_v58 = vld [vmem:[#allocation45_spill] sm:$0xff] }
 0x339   :  { %970 = vst [vmem:[%s2119_s5 + $0x90] sm:$0xff] %v890_v12  ;;  %971 = vst [vmem:[%s2119_s5 + $0x98] sm:$0xff] %v891_v61 }
 0x33a   :  { %976 = vst [vmem:[%s2119_s5 + $0xc0] sm:$0xff] %v896_v59  ;;  %977 = vst [vmem:[%s2119_s5 + $0xc8] sm:$0xff] %v897_v39  ;;  %v750_v6 = vpop.permute.xlu1 %749  ;;  %v762_v35 = vpop.permute.xlu0 %761 }
 0x33b   :  { %v894_v1 = vmul.f32 %v750_v6, %v2237_v21  ;;  %v895_v16 = vmul.f32 %v750_v6, %v2238_v42  ;;  %v900_v17 = vmul.f32 %v762_v35, %v2239_v3  ;;  %v901_v20 = vmul.f32 %v762_v35, %v2240_v0  ;;  %v2258_v6 = vld [vmem:[#allocation46_spill] sm:$0xff]  ;;  %v2260_v42 = vld [vmem:[#allocation19_spill] sm:$0xff]  ;;  %v1099_v0 = vld [vmem:[%s2114_s0 + $0x190] sm:$0xff] }
 0x33c   :  { %v2259_v21 = vld [vmem:[#allocation18_spill] sm:$0xff] }
 0x33d   :  { %974 = vst [vmem:[%s2119_s5 + $0xb0] sm:$0xff] %v894_v1  ;;  %975 = vst [vmem:[%s2119_s5 + $0xb8] sm:$0xff] %v895_v16 }
 0x33e   :  { %980 = vst [vmem:[%s2119_s5 + $0xe0] sm:$0xff] %v900_v17  ;;  %981 = vst [vmem:[%s2119_s5 + $0xe8] sm:$0xff] %v901_v20  ;;  %v758_v53 = vpop.permute.xlu1 %757  ;;  %v773_v55 = vpop.permute.xlu0 %772 }
 0x33f   :  { %v898_v52 = vmul.f32 %v758_v53, %v2241_v23  ;;  %v899_v41 = vmul.f32 %v758_v53, %v2242_v49  ;;  %v904_v25 = vmul.f32 %v773_v55, %v2243_v22  ;;  %v905_v62 = vmul.f32 %v773_v55, %v2244_v24  ;;  %v1100_v53 = vld [vmem:[%s2114_s0 + $0x198] sm:$0xff]  ;;  %v2262_v49 = vld [vmem:[#allocation30_spill] sm:$0xff] }
 0x340   :  { %v2261_v23 = vld [vmem:[#allocation29_spill] sm:$0xff] }
 0x341   :  { %978 = vst [vmem:[%s2119_s5 + $0xd0] sm:$0xff] %v898_v52  ;;  %979 = vst [vmem:[%s2119_s5 + $0xd8] sm:$0xff] %v899_v41  ;;  %v2263_v24 = vld [vmem:[#allocation25_spill] sm:$0xff] }
 0x342   :  { %984 = vst [vmem:[%s2119_s5 + $0x100] sm:$0xff] %v904_v25  ;;  %985 = vst [vmem:[%s2119_s5 + $0x108] sm:$0xff] %v905_v62  ;;  %v766_v43 = vpop.permute.xlu1 %765  ;;  %v781_v31 = vpop.permute.xlu0 %780 }
 0x343   :  { %v902_v8 = vmul.f32 %v766_v43, %v2245_v51  ;;  %v903_v4 = vmul.f32 %v766_v43, %v2246_v2  ;;  %v908_v10 = vmul.f32 %v781_v31, %v2247_v9  ;;  %v909_v14 = vmul.f32 %v781_v31, %v2248_v63  ;;  %v2264_v43 = vld [vmem:[#allocation26_spill] sm:$0xff]  ;;  %v2265_v51 = vld [vmem:[#allocation43_spill] sm:$0xff]  ;;  %v2266_v2 = vld [vmem:[#allocation44_spill] sm:$0xff] }
 0x344   :  { %v2267_v63 = vld [vmem:[#allocation41_spill] sm:$0xff] }
 0x345   :  { %982 = vst [vmem:[%s2119_s5 + $0xf0] sm:$0xff] %v902_v8  ;;  %983 = vst [vmem:[%s2119_s5 + $0xf8] sm:$0xff] %v903_v4 }
 0x346   :  { %988 = vst [vmem:[%s2119_s5 + $0x120] sm:$0xff] %v908_v10  ;;  %989 = vst [vmem:[%s2119_s5 + $0x128] sm:$0xff] %v909_v14  ;;  %v777_v15 = vpop.permute.xlu1 %776  ;;  %v789_v36 = vpop.permute.xlu0 %788 }
 0x347   :  { %v906_v45 = vmul.f32 %v1095_v37, %v777_v15  ;;  %v907_v26 = vmul.f32 %v1096_v57, %v777_v15  ;;  %v912_v28 = vmul.f32 %v789_v36, %v2249_v27  ;;  %v913_v46 = vmul.f32 %v789_v36, %v2250_v29  ;;  %v2268_v15 = vld [vmem:[#allocation42_spill] sm:$0xff]  ;;  %v1102_v57 = vld [vmem:[%s2114_s0 + $0x208] sm:$0xff] }
 0x348   :  { %v1101_v37 = vld [vmem:[%s2114_s0 + $0x200] sm:$0xff]  ;;  %v2269_v29 = vld [vmem:[#allocation47_spill] sm:$0xff] }
 0x349   :  { %986 = vst [vmem:[%s2119_s5 + $0x110] sm:$0xff] %v906_v45  ;;  %987 = vst [vmem:[%s2119_s5 + $0x118] sm:$0xff] %v907_v26 }
 0x34a   :  { %992 = vst [vmem:[%s2119_s5 + $0x140] sm:$0xff] %v912_v28  ;;  %993 = vst [vmem:[%s2119_s5 + $0x148] sm:$0xff] %v913_v46  ;;  %v785_v60 = vpop.permute.xlu1 %784  ;;  %v797_v18 = vpop.permute.xlu0 %796 }
 0x34b   :  { %v910_v44 = vmul.f32 %v785_v60, %v2251_v5  ;;  %v911_v50 = vmul.f32 %v785_v60, %v2252_v54  ;;  %v916_v13 = vmul.f32 %v797_v18, %v2253_v11  ;;  %v917_v7 = vmul.f32 %v797_v18, %v2254_v30  ;;  %v2270_v60 = vld [vmem:[#allocation48_spill] sm:$0xff]  ;;  %v1103_v5 = vld [vmem:[%s2114_s0 + $0x220] sm:$0xff]  ;;  %v1104_v54 = vld [vmem:[%s2114_s0 + $0x228] sm:$0xff] }
 0x34c   :  { %v1105_v30 = vld [vmem:[%s2114_s0 + $0x210] sm:$0xff] }
 0x34d   :  { %990 = vst [vmem:[%s2119_s5 + $0x130] sm:$0xff] %v910_v44  ;;  %991 = vst [vmem:[%s2119_s5 + $0x138] sm:$0xff] %v911_v50 }
 0x34e   :  { %996 = vst [vmem:[%s2119_s5 + $0x160] sm:$0xff] %v916_v13  ;;  %997 = vst [vmem:[%s2119_s5 + $0x168] sm:$0xff] %v917_v7  ;;  %v793_v34 = vpop.permute.xlu1 %792  ;;  %v808_v33 = vpop.permute.xlu0 %807 }
 0x34f   :  { %v914_v40 = vmul.f32 %v793_v34, %v2255_v48  ;;  %v915_v56 = vmul.f32 %v793_v34, %v2256_v38  ;;  %v920_v12 = vmul.f32 %v1097_v32, %v808_v33  ;;  %v921_v61 = vmul.f32 %v1098_v19, %v808_v33  ;;  %v1106_v34 = vld [vmem:[%s2114_s0 + $0x218] sm:$0xff]  ;;  %v2271_v48 = vld [vmem:[#allocation39_spill] sm:$0xff]  ;;  %v2272_v38 = vld [vmem:[#allocation40_spill] sm:$0xff] }
 0x350   :  { %v1107_v19 = vld [vmem:[%s2114_s0 + $0x230] sm:$0xff] }
 0x351   :  { %994 = vst [vmem:[%s2119_s5 + $0x150] sm:$0xff] %v914_v40  ;;  %995 = vst [vmem:[%s2119_s5 + $0x158] sm:$0xff] %v915_v56 }
 0x352   :  { %1000 = vst [vmem:[%s2119_s5 + $0x180] sm:$0xff] %v920_v12  ;;  %1001 = vst [vmem:[%s2119_s5 + $0x188] sm:$0xff] %v921_v61  ;;  %v801_v47 = vpop.permute.xlu1 %800  ;;  %v816_v59 = vpop.permute.xlu0 %815 }
 0x353   :  { %v918_v39 = vmul.f32 %v801_v47, %v2257_v58  ;;  %v919_v35 = vmul.f32 %v801_v47, %v2258_v6  ;;  %v924_v1 = vmul.f32 %v816_v59, %v2259_v21  ;;  %v925_v16 = vmul.f32 %v816_v59, %v2260_v42  ;;  %v1108_v47 = vld [vmem:[%s2114_s0 + $0x238] sm:$0xff]  ;;  %v2274_v6 = vld [vmem:[#allocation54_spill] sm:$0xff] }
 0x354   :  { %v2273_v58 = vld [vmem:[#allocation53_spill] sm:$0xff] }
 0x355   :  { %998 = vst [vmem:[%s2119_s5 + $0x170] sm:$0xff] %v918_v39  ;;  %999 = vst [vmem:[%s2119_s5 + $0x178] sm:$0xff] %v919_v35 }
 0x356   :  { %1004 = vst [vmem:[%s2119_s5 + $0x1a0] sm:$0xff] %v924_v1  ;;  %1005 = vst [vmem:[%s2119_s5 + $0x1a8] sm:$0xff] %v925_v16  ;;  %v812_v3 = vpop.permute.xlu1 %811  ;;  %v824_v17 = vpop.permute.xlu0 %823  ;;  %v2275_v1 = vld [vmem:[#allocation49_spill] sm:$0xff]  ;;  %v2276_v16 = vld [vmem:[#allocation50_spill] sm:$0xff] }
 0x357   :  { %v922_v20 = vmul.f32 %v1099_v0, %v812_v3  ;;  %v923_v55 = vmul.f32 %v1100_v53, %v812_v3  ;;  %v928_v52 = vmul.f32 %v824_v17, %v2261_v23  ;;  %v929_v41 = vmul.f32 %v824_v17, %v2262_v49  ;;  %v2277_v0 = vld [vmem:[#allocation51_spill] sm:$0xff]  ;;  %v2278_v53 = vld [vmem:[#allocation52_spill] sm:$0xff] }
 0x359   :  { %1002 = vst [vmem:[%s2119_s5 + $0x190] sm:$0xff] %v922_v20  ;;  %1003 = vst [vmem:[%s2119_s5 + $0x198] sm:$0xff] %v923_v55 }
 0x35a   :  { %1008 = vst [vmem:[%s2119_s5 + $0x1c0] sm:$0xff] %v928_v52  ;;  %1009 = vst [vmem:[%s2119_s5 + $0x1c8] sm:$0xff] %v929_v41  ;;  %v820_v22 = vpop.permute.xlu1 %819  ;;  %v832_v25 = vpop.permute.xlu0 %831 }
 0x35b   :  { %v926_v62 = vmul.f32 %v820_v22, %v2263_v24  ;;  %v927_v31 = vmul.f32 %v820_v22, %v2264_v43  ;;  %v932_v8 = vmul.f32 %v832_v25, %v2265_v51  ;;  %v933_v4 = vmul.f32 %v832_v25, %v2266_v2 }
 0x35d   :  { %1006 = vst [vmem:[%s2119_s5 + $0x1b0] sm:$0xff] %v926_v62  ;;  %1007 = vst [vmem:[%s2119_s5 + $0x1b8] sm:$0xff] %v927_v31 }
 0x35e   :  { %1012 = vst [vmem:[%s2119_s5 + $0x1e0] sm:$0xff] %v932_v8  ;;  %1013 = vst [vmem:[%s2119_s5 + $0x1e8] sm:$0xff] %v933_v4  ;;  %v828_v9 = vpop.permute.xlu1 %827  ;;  %v843_v10 = vpop.permute.xlu0 %842 }
 0x35f   :  { %v930_v14 = vmul.f32 %v828_v9, %v2267_v63  ;;  %v931_v36 = vmul.f32 %v828_v9, %v2268_v15  ;;  %v936_v45 = vmul.f32 %v1101_v37, %v843_v10  ;;  %v937_v26 = vmul.f32 %v1102_v57, %v843_v10 }
 0x361   :  { %1010 = vst [vmem:[%s2119_s5 + $0x1d0] sm:$0xff] %v930_v14  ;;  %1011 = vst [vmem:[%s2119_s5 + $0x1d8] sm:$0xff] %v931_v36 }
 0x362   :  { %1016 = vst [vmem:[%s2119_s5 + $0x200] sm:$0xff] %v936_v45  ;;  %1017 = vst [vmem:[%s2119_s5 + $0x208] sm:$0xff] %v937_v26  ;;  %v836_v27 = vpop.permute.xlu1 %835  ;;  %v851_v28 = vpop.permute.xlu0 %850 }
 0x363   :  { %v934_v46 = vmul.f32 %v836_v27, %v2269_v29  ;;  %v935_v18 = vmul.f32 %v836_v27, %v2270_v60  ;;  %v940_v44 = vmul.f32 %v1103_v5, %v851_v28  ;;  %v941_v50 = vmul.f32 %v1104_v54, %v851_v28 }
 0x365   :  { %1014 = vst [vmem:[%s2119_s5 + $0x1f0] sm:$0xff] %v934_v46  ;;  %1015 = vst [vmem:[%s2119_s5 + $0x1f8] sm:$0xff] %v935_v18 }
 0x366   :  { %1020 = vst [vmem:[%s2119_s5 + $0x220] sm:$0xff] %v940_v44  ;;  %1021 = vst [vmem:[%s2119_s5 + $0x228] sm:$0xff] %v941_v50  ;;  %v847_v11 = vpop.permute.xlu1 %846  ;;  %v859_v13 = vpop.permute.xlu0 %858 }
 0x367   :  { %v938_v7 = vmul.f32 %v1105_v30, %v847_v11  ;;  %v939_v33 = vmul.f32 %v1106_v34, %v847_v11  ;;  %v944_v40 = vmul.f32 %v859_v13, %v2271_v48  ;;  %v945_v56 = vmul.f32 %v859_v13, %v2272_v38 }
 0x369   :  { %1018 = vst [vmem:[%s2119_s5 + $0x210] sm:$0xff] %v938_v7  ;;  %1019 = vst [vmem:[%s2119_s5 + $0x218] sm:$0xff] %v939_v33 }
 0x36a   :  { %1024 = vst [vmem:[%s2119_s5 + $0x240] sm:$0xff] %v944_v40  ;;  %1025 = vst [vmem:[%s2119_s5 + $0x248] sm:$0xff] %v945_v56  ;;  %v855_v32 = vpop.permute.xlu1 %854  ;;  %v867_v12 = vpop.permute.xlu0 %866 }
 0x36b   :  { %v942_v61 = vmul.f32 %v1107_v19, %v855_v32  ;;  %v943_v59 = vmul.f32 %v1108_v47, %v855_v32  ;;  %v948_v39 = vmul.f32 %v867_v12, %v2273_v58  ;;  %v949_v35 = vmul.f32 %v867_v12, %v2274_v6 }
 0x36d   :  { %1022 = vst [vmem:[%s2119_s5 + $0x230] sm:$0xff] %v942_v61  ;;  %1023 = vst [vmem:[%s2119_s5 + $0x238] sm:$0xff] %v943_v59 }
 0x36e   :  { %1028 = vst [vmem:[%s2119_s5 + $0x260] sm:$0xff] %v948_v39  ;;  %1029 = vst [vmem:[%s2119_s5 + $0x268] sm:$0xff] %v949_v35  ;;  %v863_v21 = vpop.permute.xlu1 %862 }
 0x36f   :  { %v946_v42 = vmul.f32 %v863_v21, %v2275_v1  ;;  %v947_v3 = vmul.f32 %v863_v21, %v2276_v16 }
 0x371   :  { %1026 = vst [vmem:[%s2119_s5 + $0x250] sm:$0xff] %v946_v42  ;;  %1027 = vst [vmem:[%s2119_s5 + $0x258] sm:$0xff] %v947_v3 }
 0x372   :  { %v871_v17 = vpop.permute.xlu1 %870 }
 0x373   :  { %v950_v20 = vmul.f32 %v871_v17, %v2277_v0  ;;  %v951_v55 = vmul.f32 %v871_v17, %v2278_v53 }
 0x375   :  { %1030 = vst [vmem:[%s2119_s5 + $0x270] sm:$0xff] %v950_v20  ;;  %1031 = vst [vmem:[%s2119_s5 + $0x278] sm:$0xff] %v951_v55 }

</bundles_post_ra>
